<compile_context>
chip_gen: v7x
topology: tpu7x:2x2x1
jax: 0.10.0
libtpu: 0.0.40
codegen_flags: <defaults>
</compile_context>

<pallas_src>
import functools

import jax
import jax.numpy as jnp
from jax.experimental import pallas as pl
from jax.experimental.pallas import tpu as pltpu

_LANE = 128
_SUBLANE = 8
_MAX_TILE_ROWS = 4096   # (4096,128) f32 block = 2 MiB; 2 inputs x 2 bufs = 8 MiB VMEM


def _round_up(a, b):
    return ((a + b - 1) // b) * b


def _sublane_multiple(dtype):
    # Second-minor tiling multiple: 8 for 32-bit, 16 for 16-bit, 32 for 8-bit.
    return max(_SUBLANE, 32 // jnp.dtype(dtype).itemsize)


def _num_tensorcores():
    """Best-effort chip detection: 2 partitions on v7x (2 TCs/chip), else 1."""
    try:
        kind = jax.devices()[0].device_kind.lower()
    except Exception:
        kind = ""
    return 2 if ("v7" in kind or "7x" in kind) else 1


def _sse_kernel(x_ref, t_ref, out_ref, acc_ref, *,
                rows, tile_rows, nblocks, mask_needed):
    """Per-partition sum of squared differences.

    grid = (nparts, steps): p = parallel partition (one per TensorCore on
    v7x), i = sequential reduction axis.
      x_ref, t_ref : (tile_rows, 128) VMEM input tiles
      out_ref      : (1, 1) SMEM partial sum (one per partition)
      acc_ref      : (8, 128) f32 VMEM vector accumulator (scratch)
    Static closure constants: rows, tile_rows, nblocks, mask_needed.
    """
    p = pl.program_id(0)
    i = pl.program_id(1)
    steps = pl.num_programs(1)

    @pl.when(i == 0)
    def _():
        acc_ref[...] = jnp.zeros_like(acc_ref)

    # Logical (UNclamped) block id: the index_map clamps overhanging steps to
    # the last real block, so blk >= nblocks identifies pure-overhang steps.
    blk = p * steps + i

    def _accum(d):
        # Fold (tile_rows,128) -> (8,128) with pure VPU adds: no per-step
        # cross-lane (XLU) reduction, no SMEM read-modify-write chain.
        acc_ref[...] += jnp.sum((d * d).reshape(-1, _SUBLANE, _LANE), axis=0)

    if not mask_needed:
        # Every block is full and there are no overhang steps: mask-free.
        d = x_ref[...].astype(jnp.float32) - t_ref[...].astype(jnp.float32)
        _accum(d)
    else:
        # Only the last real block (if partial) and overhang steps need the
        # row-validity mask; interior blocks take the mask-free fast path.
        mask_from = (nblocks - 1) if (rows % tile_rows) else nblocks

        @pl.when(blk < mask_from)
        def _():
            d = x_ref[...].astype(jnp.float32) - t_ref[...].astype(jnp.float32)
            _accum(d)

        @pl.when(blk >= mask_from)
        def _():
            row_ids = blk * tile_rows + jax.lax.broadcasted_iota(
                jnp.int32, (tile_rows, _LANE), 0)
            d = x_ref[...].astype(jnp.float32) - t_ref[...].astype(jnp.float32)
            d = jnp.where(row_ids < rows, d, 0.0)
            _accum(d)

    @pl.when(i == steps - 1)
    def _():
        out_ref[0, 0] = jnp.sum(acc_ref[...])


def _sse_pallas(x2d, t2d, rows):
    """Sum of squared differences over lane-dense (rows, 128) views."""
    sub = max(_sublane_multiple(x2d.dtype), _sublane_multiple(t2d.dtype))
    tile_rows = min(_MAX_TILE_ROWS, _round_up(rows, sub))
    nblocks = pl.cdiv(rows, tile_rows)
    nparts = min(_num_tensorcores(), nblocks)
    steps = pl.cdiv(nblocks, nparts)
    mask_needed = (rows % tile_rows != 0) or (nparts * steps != nblocks)

    def in_map(p, i):
        # Clamp so overhanging steps re-read the last real block; the
        # in-kernel row mask zeroes their contribution.
        return (jnp.minimum(p * steps + i, nblocks - 1), 0)

    kernel = functools.partial(
        _sse_kernel, rows=rows, tile_rows=tile_rows,
        nblocks=nblocks, mask_needed=mask_needed)

    nbytes = rows * _LANE * (jnp.dtype(x2d.dtype).itemsize
                             + jnp.dtype(t2d.dtype).itemsize)
    partials = pl.pallas_call(
        kernel,
        out_shape=jax.ShapeDtypeStruct((nparts, 1), jnp.float32),
        grid_spec=pltpu.PrefetchScalarGridSpec(
            num_scalar_prefetch=0,
            grid=(nparts, steps),
            in_specs=[
                pl.BlockSpec((tile_rows, _LANE), in_map),
                pl.BlockSpec((tile_rows, _LANE), in_map),
            ],
            out_specs=pl.BlockSpec(
                (1, 1), lambda p, i: (p, 0), memory_space=pltpu.SMEM),
            scratch_shapes=[pltpu.VMEM((_SUBLANE, _LANE), jnp.float32)],
        ),
        compiler_params=pltpu.CompilerParams(
            dimension_semantics=("parallel", "arbitrary"),
            vmem_limit_bytes=32 * 1024 * 1024),
        cost_estimate=pl.CostEstimate(
            flops=3 * rows * _LANE,
            transcendentals=0,
            bytes_accessed=nbytes + 4 * nparts),
    )(x2d, t2d)
    return jnp.sum(partials)


def content_loss_forward(x, target, weight):
    """ContentLoss.forward: loss = mse(x, target) * weight; returns (x, loss)."""
    assert x.shape == target.shape, "input/target shape mismatch"
    n = x.size
    if n == 0:
        return x, jnp.float32(0.0)

    if n % _LANE == 0:
        rows = n // _LANE
        # Contiguous reshape to a lane-dense (rows, 128) view: zero-copy.
        sse = _sse_pallas(x.reshape(rows, _LANE),
                          target.reshape(rows, _LANE), rows)
    else:
        # Rare unaligned case (n % 128 != 0): slicing a 128-aligned prefix
        # would force XLA to materialize a near-full copy of BOTH tensors
        # (~2-3x HBM traffic for a bandwidth-bound op), so this path uses a
        # single fused XLA reduction instead (one read of each input).
        sse = jnp.sum((x.astype(jnp.float32) - target.astype(jnp.float32)) ** 2)

    # weight / N scaling stays in plain JAX: a changing weight never retraces
    # or recompiles the Mosaic kernel.
    loss = sse * (jnp.float32(weight) / jnp.float32(n))

    # TODO(synk): content_hook (backward-pass gradient re-normalization and
    # mask multiply) is an autograd hook, not part of the forward pass; not ported.
    return x, loss


if __name__ == "__main__":
    key = jax.random.PRNGKey(0)
    weight = 0.5

    def _check(shape):
        kx, kt = jax.random.split(jax.random.fold_in(key, sum(shape)))
        x = jax.random.normal(kx, shape, dtype=jnp.float32)
        t = jax.random.normal(kt, shape, dtype=jnp.float32)
        out, loss = content_loss_forward(x, t, weight)
        jax.block_until_ready((out, loss))
        ref = jnp.mean((x - t) ** 2) * weight
        assert jnp.allclose(loss, ref, rtol=1e-5, atol=1e-6), (shape, loss, ref)
        assert jnp.array_equal(out, x)

    # primary demo shape (NCHW): single full block, mask-free fast path
    _check((2, 4, 16, 16))
    # partial last block -> masked path
    _check((1, 1, 10, 128))
    # multi-block / multi-step reduction
    _check((2, 8, 256, 256))
    # n % 128 != 0 -> fused-XLA fallback path
    _check((2, 3, 5, 7))

    print("KERNEL_OK")
</pallas_src>

<mosaic_0001>
module attributes {stable_mosaic.version = 11 : i64} {
  func.func @_sse_kernel(%arg0: i32, %arg1: i32, %arg2: memref<16x128xf32, #tpu.memory_space<vmem>>, %arg3: memref<16x128xf32, #tpu.memory_space<vmem>>, %arg4: memref<1x1xf32, #tpu.memory_space<smem>>, %arg5: memref<8x128xf32, #tpu.memory_space<vmem>>) attributes {dimension_semantics = [#tpu.dimension_semantics<parallel>, #tpu.dimension_semantics<arbitrary>], iteration_bounds = array<i64: 1, 1>, scalar_prefetch = 0 : i64, scratch_operands = 1 : i64, tpu.core_type = #tpu.core_type<tc>, window_params = [{transform_indices = @transform_0, window_bounds = array<i64: 16, 128>}, {transform_indices = @transform_1, window_bounds = array<i64: 16, 128>}, {transform_indices = @transform_2, window_bounds = array<i64: 1, 1>}]} {
    %c0_i32 = arith.constant 0 : i32
    %0 = arith.cmpi eq, %arg1, %c0_i32 : i32
    %1 = arith.extui %0 : i1 to i32
    %c0_i32_0 = arith.constant 0 : i32
    %2 = arith.cmpi ne, %1, %c0_i32_0 : i32
    scf.if %2 {
      %cst_10 = arith.constant 0.000000e+00 : f32
      %15 = vector.broadcast %cst_10 : f32 to vector<8x128xf32>
      %c0_11 = arith.constant 0 : index
      %c0_12 = arith.constant 0 : index
      %16 = vector.load %arg5[%c0_11, %c0_12] : memref<8x128xf32, #tpu.memory_space<vmem>>, vector<8x128xf32>
      tpu.vector_store %arg5[%c0_11, %c0_12], %15 {strides = array<i32>} : memref<8x128xf32, #tpu.memory_space<vmem>>, vector<8x128xf32>,
    } else {
    }
    %c0 = arith.constant 0 : index
    %c0_1 = arith.constant 0 : index
    %3 = vector.load %arg2[%c0, %c0_1] : memref<16x128xf32, #tpu.memory_space<vmem>>, vector<16x128xf32>
    %c0_2 = arith.constant 0 : index
    %c0_3 = arith.constant 0 : index
    %4 = vector.load %arg3[%c0_2, %c0_3] : memref<16x128xf32, #tpu.memory_space<vmem>>, vector<16x128xf32>
    %5 = arith.subf %3, %4 : vector<16x128xf32>
    %c0_4 = arith.constant 0 : index
    %c0_5 = arith.constant 0 : index
    %6 = vector.load %arg5[%c0_4, %c0_5] : memref<8x128xf32, #tpu.memory_space<vmem>>, vector<8x128xf32>
    %7 = arith.mulf %5, %5 : vector<16x128xf32>
    %8 = vector.shape_cast %7 : vector<16x128xf32> to vector<2x8x128xf32>
    %cst = arith.constant dense<0.000000e+00> : vector<8x128xf32>
    %9 = vector.multi_reduction <add>, %8, %cst [0] : vector<2x8x128xf32> to vector<8x128xf32>
    %10 = arith.addf %6, %9 : vector<8x128xf32>
    %c0_6 = arith.constant 0 : index
    %c0_7 = arith.constant 0 : index
    %11 = vector.load %arg5[%c0_6, %c0_7] : memref<8x128xf32, #tpu.memory_space<vmem>>, vector<8x128xf32>
    tpu.vector_store %arg5[%c0_6, %c0_7], %10 {strides = array<i32>} : memref<8x128xf32, #tpu.memory_space<vmem>>, vector<8x128xf32>,
    %c0_i32_8 = arith.constant 0 : i32
    %12 = arith.cmpi eq, %arg1, %c0_i32_8 : i32
    %13 = arith.extui %12 : i1 to i32
    %c0_i32_9 = arith.constant 0 : i32
    %14 = arith.cmpi ne, %13, %c0_i32_9 : i32
    scf.if %14 {
      %c0_10 = arith.constant 0 : index
      %c0_11 = arith.constant 0 : index
      %15 = vector.load %arg5[%c0_10, %c0_11] : memref<8x128xf32, #tpu.memory_space<vmem>>, vector<8x128xf32>
      %16 = vector.shape_cast %15 : vector<8x128xf32> to vector<1x8x128xf32>
      %cst_12 = arith.constant dense<0.000000e+00> : vector<1xf32>
      %17 = vector.multi_reduction <add>, %16, %cst_12 [1, 2] : vector<1x8x128xf32> to vector<1xf32>
      %18 = vector.shape_cast %17 : vector<1xf32> to vector<1x1x1xf32>
      %19 = vector.extract %18[0, 0, 0] : f32 from vector<1x1x1xf32>
      %c0_13 = arith.constant 0 : index
      %c0_14 = arith.constant 0 : index
      %20 = memref.load %arg4[%c0_13, %c0_14] : memref<1x1xf32, #tpu.memory_space<smem>>
      memref.store %19, %arg4[%c0_13, %c0_14] : memref<1x1xf32, #tpu.memory_space<smem>>
    } else {
    }
    return
  }
  func.func @transform_0(%arg0: i32, %arg1: i32) -> (i32, i32) {
    %c1_i32 = arith.constant 1 : i32
    %0 = arith.muli %arg0, %c1_i32 : i32
    %1 = arith.addi %0, %arg1 : i32
    %c0_i32 = arith.constant 0 : i32
    %2 = arith.minsi %1, %c0_i32 : i32
    %c0_i32_0 = arith.constant 0 : i32
    %c0_i32_1 = arith.constant 0 : i32
    return %2, %c0_i32_0 : i32, i32
  }
  func.func @transform_1(%arg0: i32, %arg1: i32) -> (i32, i32) {
    %c1_i32 = arith.constant 1 : i32
    %0 = arith.muli %arg0, %c1_i32 : i32
    %1 = arith.addi %0, %arg1 : i32
    %c0_i32 = arith.constant 0 : i32
    %2 = arith.minsi %1, %c0_i32 : i32
    %c0_i32_0 = arith.constant 0 : i32
    %c0_i32_1 = arith.constant 0 : i32
    return %2, %c0_i32_0 : i32, i32
  }
  func.func @transform_2(%arg0: i32, %arg1: i32) -> (i32, i32) {
    %c0_i32 = arith.constant 0 : i32
    %c0_i32_0 = arith.constant 0 : i32
    return %arg0, %c0_i32 : i32, i32
  }
}

</mosaic_0001>

<bundles_post_ra>
// kernel: tpu_custom_call.1
= control target key start
LH: loop header
LB: loop body
LE: loop exit
PB: predicated region body
PF: predicated region fallthrough
CT: control target
= control target key end

     0   :  { %7 = vsyncpa [#allocation4], 0  ;;  %s234_s0 = inlined_call_operand.hbm [shape: f32[16,128], index: 0, kind: input, shape index: {}]   ;;  %s235_s1 = inlined_call_operand.hbm [shape: f32[16,128], index: 1, kind: input, shape index: {}]   ;;  %s236_s2 = inlined_call_operand.hbm [shape: f32[1,1], index: 2, kind: output, shape index: {}]  }
   0x1   :  { %8 = vsyncpa [#allocation7], 0 }
   0x2   :  { %9 = vsyncpa [#allocation5], 0  ;;  %s178_s9 = smov [#allocation3]   ;;  %s118_s13 = scalar_lea.hbm %s234_s0, 256 }
   0x3   :  { %s21_s10 = sshll.u32 %s178_s9, 4  ;;  %p119_p0 = scmp.ne.s32.totalorder %s234_s0, %s118_s13  ;;  %s22_s10 = int_to_ptr.vmem [resolvable:$true] %s21_s10 }
   0x4   :  { %p122_p1 = scmp.lt.u32.totalorder %s118_s13, %s234_s0 }
   0x6   :  { %p124_p2 = pnand %p122_p1, %p119_p0 }
   0x8   :  { %127 = shalt.err (!%p124_p2)
}
   0x9   :  { %s128_s18 = scalar_lea.vmem %s22_s10, 256  ;;  %p133_p4 = scmp.lt.s32.totalorder %s22_s10, %s22_s10 }
   0xa   :  { %p129_p3 = scmp.ne.s32.totalorder %s22_s10, %s128_s18  ;;  %p134_p5 = scmp.lt.s32.totalorder %s128_s18, %s128_s18 }
   0xc   :  { %p135_p6 = por %p134_p5, %p133_p4 }
   0xe   :  { %p136_p7 = pnand %p135_p6, %p129_p3 }
  0x10   :  { %139 = shalt.err (!%p136_p7)
}
  0x11   :  { %s179_s19 = smov 128   ;;  %s180_s20 = smov 8  }
  0x12   :  { %27 = dma.hbm_to_vmem [thread:$0]  %s234_s0, 256, %s22_s10, [#allocation4], %s179_s19, %s179_s19, %s180_s20  }
  0x13   :  { %s181_s23 = smov [#allocation6]   ;;  %s140_s27 = scalar_lea.hbm %s235_s1, 256 }
  0x14   :  { %s39_s24 = sshll.u32 %s181_s23, 4  ;;  %p141_p8 = scmp.ne.s32.totalorder %s235_s1, %s140_s27  ;;  %s40_s24 = int_to_ptr.vmem [resolvable:$true] %s39_s24 }
  0x15   :  { %p144_p9 = scmp.lt.u32.totalorder %s140_s27, %s235_s1 }
  0x17   :  { %p146_p10 = pnand %p144_p9, %p141_p8 }
  0x19   :  { %149 = shalt.err (!%p146_p10)
}
  0x1a   :  { %s150_s4 = scalar_lea.vmem %s40_s24, 256  ;;  %p155_p12 = scmp.lt.s32.totalorder %s40_s24, %s40_s24 }
  0x1b   :  { %p151_p11 = scmp.ne.s32.totalorder %s40_s24, %s150_s4  ;;  %p156_p13 = scmp.lt.s32.totalorder %s150_s4, %s150_s4 }
  0x1d   :  { %p157_p0 = por %p156_p13, %p155_p12 }
  0x1f   :  { %p158_p1 = pnand %p157_p0, %p151_p11 }
  0x21   :  { %161 = shalt.err (!%p158_p1)
}
  0x22   :  { %45 = dma.hbm_to_vmem [thread:$0]  %s235_s1, 256, %s40_s24, [#allocation7], %s179_s19, %s179_s19, %s180_s20  }
  0x23   :  { %172 = dma.done.wait [#allocation4], 256  }
  0x24   :  { %173 = vsyncadd [#allocation4], 4294967040 }
  0x25   :  { %174 = dma.done.wait [#allocation7], 256  }
  0x26   :  { %175 = vsyncadd [#allocation7], 4294967040  ;;  %v65_v0 = vld [vmem:[#allocation3] sm:$0xff]  ;;  %v66_v1 = vld [vmem:[#allocation3 + $0x8] sm:$0xff]  ;;  %s162_s8 = scalar_lea.hbm %s236_s2, 16 }
  0x27   :  { %v67_v2 = vld [vmem:[#allocation6] sm:$0xff]  ;;  %v68_v3 = vld [vmem:[#allocation6 + $0x8] sm:$0xff]  ;;  %p163_p2 = scmp.ne.s32.totalorder %s236_s2, %s162_s8  ;;  %p166_p3 = scmp.lt.u32.totalorder %s162_s8, %s236_s2 }
  0x28   :  { %v69_v4 = vsub.f32 %v65_v0, %v67_v2  ;;  %v70_v5 = vsub.f32 %v66_v1, %v68_v3 }
  0x29   :  { %p168_p4 = pnand %p166_p3, %p163_p2 }
  0x2a   :  { %v72_v6 = vmul.f32 %v69_v4, %v69_v4  ;;  %v73_v7 = vmul.f32 %v70_v5, %v70_v5 }
  0x2c   :  { %v74_v8 = vadd.f32 %v73_v7, %v72_v6 }
  0x2e   :  { %81 = vadd.xlane.f32.xlu0 %v74_v8 }
  0xbb   :  { %v82_v9 = vpop.xlane.xlu0 %81 }
  0xbc   :  { %v83_v10 = vrot.slane %v82_v9, 4 }
  0xbe   :  { %v84_v11 = vadd.f32 %v83_v10, %v82_v9 }
  0xc0   :  { %v85_v12 = vrot.slane %v84_v11, 2 }
  0xc2   :  { %v86_v13 = vadd.f32 %v85_v12, %v84_v11 }
  0xc4   :  { %v87_v14 = vrot.slane %v86_v13, 1 }
  0xc6   :  { %v88_v15 = vadd.f32 %v87_v14, %v86_v13 }
  0xc8   :  { %111 = vpush %v88_v15 }
  0xf9   :  { %s112_s1 = spop %111 }
  0xfa   :  { %91 = sst [smem:[#allocation8]] %s112_s1 }
  0xfb   :  { %171 = shalt.err (!%p168_p4)
}
  0xfc   :  { %s182_s13 = smov [#allocation8]  }
  0xfd   :  { %99 = dma.smem_to_hbm %s182_s13, 16, %s236_s2, [#allocation5]  }
  0xfe   :  { %176 = dma.done.wait [#allocation5], 16  }
  0xff   :  { %177 = vsyncadd [#allocation5], 4294967280 }
 0x100   :  { %103 = sfence }
 0x101   :  { %104 = vsyncpa [#allocation4], 1 }
 0x102   :  { %105 = vsyncpa [#allocation7], 1 }
 0x103   :  { %106 = vsyncpa [#allocation5], 1 }

</bundles_post_ra>
